<compile_context>
chip_gen: v5e
topology: v5e:2x2
jax: 0.10.0
libtpu: 0.0.40
codegen_flags: <defaults>
</compile_context>

<pallas_src>
import math

import jax
import jax.numpy as jnp
from jax.experimental import pallas as pl
from jax.experimental.pallas import tpu as pltpu


# --------------------------------------------------------------------------- #
# Kernels
# --------------------------------------------------------------------------- #
def _compute_block(coef_ref, xy_ref):
    """res[a, b, l] = P*xy + Q*yx + R in interleaved lane layout (x0,y0,x1,y1,...).

    coef_ref: [A_tile, TB, 6]  columns = (p_even, p_odd, q_even, q_odd, r_even, r_odd)
    xy_ref:   [TB, 2N]
    returns:  [A_tile, TB, 2N]
    """
    coef = coef_ref[...]
    xy = xy_ref[...]
    two_n = xy.shape[-1]

    lane = jax.lax.broadcasted_iota(jnp.int32, (1, 1, two_n), 2)
    even = (lane & 1) == 0                       # True on x-slots

    # yx = adjacent-pair swap of xy: even lanes take the next lane (y), odd
    # lanes take the previous lane (x); wrap-around lanes are discarded by the
    # parity select.
    yx = jnp.where(even[0], jnp.roll(xy, -1, axis=-1), jnp.roll(xy, 1, axis=-1))

    p = jnp.where(even, coef[:, :, 0:1], coef[:, :, 1:2])
    q = jnp.where(even, coef[:, :, 2:3], coef[:, :, 3:4])
    r = jnp.where(even, coef[:, :, 4:5], coef[:, :, 5:6])
    return p * xy[None] + q * yx[None] + r


def _write_kernel(coef_ref, xy_ref, out_ref):
    out_ref[...] = _compute_block(coef_ref, xy_ref)


def _minmax_kernel(coef_ref, xy_ref, mn_ref, mx_ref):
    res = _compute_block(coef_ref, xy_ref)
    mn_ref[...] = jnp.reshape(jnp.min(res), (1, 1, 1, 1))
    mx_ref[...] = jnp.reshape(jnp.max(res), (1, 1, 1, 1))


# --------------------------------------------------------------------------- #
# Tiling / VMEM budget
# --------------------------------------------------------------------------- #
def _vmem_budget():
    """Return (working-set budget for tile picking, vmem_limit_bytes for Mosaic)."""
    try:
        cap = int(pltpu.get_tpu_info().vmem_capacity_bytes)
    except Exception:
        cap = 0
    if cap >= 100 * 1024 * 1024:                 # v5e / v6e: 128 MiB physical VMEM
        return 48 * 1024 * 1024, 100 * 1024 * 1024
    if cap > 0:                                  # v7x: 64 MiB physical, leave headroom
        return 24 * 1024 * 1024, 44 * 1024 * 1024
    return 12 * 1024 * 1024, 40 * 1024 * 1024    # unknown backend: conservative


def _pick_tiles(A, B, two_n, budget_bytes):
    """Choose (a_tile, tile_b): biggest step that fits the double-buffered budget."""

    def working_set(at, tb):
        out_blk = at * tb * two_n * 4
        src_blk = tb * two_n * 4
        coef_blk = at * tb * 6 * 4
        return 2 * (out_blk + src_blk + coef_blk)      # x2: pipeline double buffers

    a_tile = 1
    for cand in [d for d in range(A, 0, -1) if A % d == 0]:
        if working_set(cand, min(B, 8)) <= budget_bytes:
            a_tile = cand
            break

    if working_set(a_tile, B) <= budget_bytes:
        return a_tile, B                                # whole batch in one tile

    per_row = 2 * 4 * (a_tile * two_n + two_n + a_tile * 6)
    tile_b = max(8, (budget_bytes // per_row) // 8 * 8)
    tile_b = min(tile_b, ((B + 7) // 8) * 8)
    return a_tile, tile_b


# --------------------------------------------------------------------------- #
# Pallas-call wrappers
# --------------------------------------------------------------------------- #
def _grid_and_specs(A, Bp, two_n, a_tile, tile_b):
    grid = (Bp // tile_b, A // a_tile)
    coef_spec = pl.BlockSpec((a_tile, tile_b, 6), lambda bt, ab: (ab, bt, 0))
    # Source ignores the (innermost) A-block index -> not re-DMA'd across A steps.
    xy_spec = pl.BlockSpec((tile_b, two_n), lambda bt, ab: (bt, 0))
    return grid, coef_spec, xy_spec


def _write_pass(coef, xy, a_tile, tile_b, vmem_limit):
    A, Bp, _ = coef.shape
    two_n = xy.shape[-1]
    grid, coef_spec, xy_spec = _grid_and_specs(A, Bp, two_n, a_tile, tile_b)
    out_spec = pl.BlockSpec((a_tile, tile_b, two_n), lambda bt, ab: (ab, bt, 0))
    return pl.pallas_call(
        _write_kernel,
        grid=grid,
        in_specs=[coef_spec, xy_spec],
        out_specs=out_spec,
        out_shape=jax.ShapeDtypeStruct((A, Bp, two_n), jnp.float32),
        compiler_params=pltpu.CompilerParams(
            dimension_semantics=("parallel", "parallel"),
            vmem_limit_bytes=int(vmem_limit),
        ),
    )(coef, xy)


def _minmax_pass(coef, xy, a_tile, tile_b, vmem_limit):
    A, Bp, _ = coef.shape
    two_n = xy.shape[-1]
    grid, coef_spec, xy_spec = _grid_and_specs(A, Bp, two_n, a_tile, tile_b)
    nbt, nab = grid
    mm_spec = pl.BlockSpec((1, 1, 1, 1), lambda bt, ab: (bt, ab, 0, 0))
    mm_shape = jax.ShapeDtypeStruct((nbt, nab, 1, 1), jnp.float32)
    return pl.pallas_call(
        _minmax_kernel,
        grid=grid,
        in_specs=[coef_spec, xy_spec],
        out_specs=[mm_spec, mm_spec],
        out_shape=(mm_shape, mm_shape),
        compiler_params=pltpu.CompilerParams(
            dimension_semantics=("parallel", "parallel"),
            vmem_limit_bytes=int(vmem_limit),
        ),
    )(coef, xy)


# --------------------------------------------------------------------------- #
# Wrapper (the module's forward for feat = 'locs')
# --------------------------------------------------------------------------- #
def _row_coefficients(phi):
    """Per-row coefficients so that res = P*xy + Q*yx + R reproduces
    rotation + reflection + the +/-0.5 offsets exactly.  phi: [A, B]."""
    c = jnp.cos(phi)
    s = jnp.sin(phi)
    refl = phi > (2.0 * math.pi)
    p_even = jnp.where(refl, s, c)
    q_even = jnp.where(refl, c, -s)
    p_odd = jnp.where(refl, -s, c)
    q_odd = jnp.where(refl, c, s)
    r_even = 0.5 - 0.5 * (p_even + q_even)
    r_odd = 0.5 - 0.5 * (p_odd + q_odd)
    return jnp.stack([p_even, p_odd, q_even, q_odd, r_even, r_odd], axis=-1)


def state_augmentation(locs, key, num_augment: int = 8, normalize: bool = False,
                       *, _tile_b=None, _a_tile=None):
    """JAX/Pallas equivalent of StateAugmentation.forward for env feats=('locs',).

    locs: [B, N, 2] coordinates in [0, 1].  Returns [num_augment * B, N, 2] f32.
    """
    locs = locs.astype(jnp.float32)
    B, N, _ = locs.shape
    A = num_augment
    two_n = 2 * N

    # phi = rand(A*B) * 4*pi ; phi[:B] = 0   (augmented row a*B + b uses phi[a*B + b])
    phi = jax.random.uniform(key, (A * B,), dtype=jnp.float32) * (4.0 * math.pi)
    phi = phi.at[:B].set(0.0)
    phi = phi.reshape(A, B)

    budget, vmem_limit = _vmem_budget()
    a_tile, tile_b = _pick_tiles(A, B, two_n, budget)
    if _a_tile is not None:
        a_tile = _a_tile
    if _tile_b is not None:
        tile_b = _tile_b
    assert A % a_tile == 0

    # Pad B up to a multiple of tile_b by edge-replication; padded rows are exact
    # duplicates of real rows, so the global min/max are unaffected.
    Bp = -(-B // tile_b) * tile_b
    xy = locs.reshape(B, two_n)                      # interleaved x0,y0,x1,y1,...
    if Bp != B:
        xy = jnp.pad(xy, ((0, Bp - B), (0, 0)), mode="edge")
        phi = jnp.pad(phi, ((0, 0), (0, Bp - B)), mode="edge")

    coef = _row_coefficients(phi)                    # [A, Bp, 6]

    if normalize:
        # Pass 1: per-step min/max only (reads only the small source, no big write).
        mn_t, mx_t = _minmax_pass(coef, xy, a_tile, tile_b, vmem_limit)
        mn = mn_t.min()
        mx = mx_t.max()
        inv = 1.0 / (mx - mn)                        # matches torch min_max_normalize (no 0-div guard)
        # Fold the global rescale into the per-row coefficients: zero extra VALU in pass 2.
        coef = jnp.concatenate([coef[..., :4] * inv, (coef[..., 4:] - mn) * inv], axis=-1)

    out = _write_pass(coef, xy, a_tile, tile_b, vmem_limit)   # [A, Bp, 2N]
    if Bp != B:
        out = out[:, :B, :]
    # [A, B, 2N] -> [A*B, N, 2] is a pure metadata reshape (row-major compatible).
    return out.reshape(A * B, N, 2)


# --------------------------------------------------------------------------- #
# Pure-JAX reference (mirrors the PyTorch code exactly)
# --------------------------------------------------------------------------- #
def _reference(locs, phi_flat, num_augment: int, normalize: bool):
    B, N, _ = locs.shape
    A = num_augment
    xy = jnp.broadcast_to(locs[None], (A, B, N, 2)).reshape(A * B, N, 2)
    phi = phi_flat.reshape(A * B, 1, 1)
    x = xy[..., 0:1] - 0.5
    y = xy[..., 1:2] - 0.5
    x_p = jnp.cos(phi) * x - jnp.sin(phi) * y
    y_p = jnp.sin(phi) * x + jnp.cos(phi) * y
    out = jnp.concatenate([x_p, y_p], axis=-1)
    out = jnp.where(phi > 2.0 * math.pi, out[..., ::-1], out) + 0.5
    if normalize:
        out = (out - out.min()) / (out.max() - out.min())
    return out


if __name__ == "__main__":
    key = jax.random.PRNGKey(0)
    k_locs, k_phi, k_locs2, k_phi2, k_locs3, k_phi3 = jax.random.split(key, 6)
    A = 8

    # --- test 1: tiny shape, single tile, with and without normalize ---------
    B, N = 2, 8
    locs = jax.random.uniform(k_locs, (B, N, 2), dtype=jnp.float32)
    out = jax.block_until_ready(
        state_augmentation(locs, k_phi, num_augment=A, normalize=False))
    phi_flat = jax.random.uniform(k_phi, (A * B,), dtype=jnp.float32) * (4.0 * math.pi)
    phi_flat = phi_flat.at[:B].set(0.0)
    ref = _reference(locs, phi_flat, A, False)
    assert out.shape == (A * B, N, 2)
    assert jnp.allclose(out, ref, atol=1e-5, rtol=1e-5)

    out_n = jax.block_until_ready(
        state_augmentation(locs, k_phi, num_augment=A, normalize=True))
    ref_n = _reference(locs, phi_flat, A, True)
    assert jnp.allclose(out_n, ref_n, atol=1e-5, rtol=1e-5)

    # --- test 2: multi-tile grid with the A axis split across steps ----------
    B2, N2 = 24, 16
    locs2 = jax.random.uniform(k_locs2, (B2, N2, 2), dtype=jnp.float32)
    out2 = jax.block_until_ready(
        state_augmentation(locs2, k_phi2, num_augment=A, normalize=True,
                           _tile_b=8, _a_tile=4))
    phi2 = jax.random.uniform(k_phi2, (A * B2,), dtype=jnp.float32) * (4.0 * math.pi)
    phi2 = phi2.at[:B2].set(0.0)
    ref2 = _reference(locs2, phi2, A, True)
    assert out2.shape == (A * B2, N2, 2)
    assert jnp.allclose(out2, ref2, atol=1e-5, rtol=1e-5)

    # --- test 3: batch not divisible by the tile -> padded-tail path ---------
    B3, N3 = 10, 12
    locs3 = jax.random.uniform(k_locs3, (B3, N3, 2), dtype=jnp.float32)
    out3 = jax.block_until_ready(
        state_augmentation(locs3, k_phi3, num_augment=A, normalize=True, _tile_b=8))
    phi3 = jax.random.uniform(k_phi3, (A * B3,), dtype=jnp.float32) * (4.0 * math.pi)
    phi3 = phi3.at[:B3].set(0.0)
    ref3 = _reference(locs3, phi3, A, True)
    assert out3.shape == (A * B3, N3, 2)
    assert jnp.allclose(out3, ref3, atol=1e-5, rtol=1e-5)

    print("KERNEL_OK")
</pallas_src>

<mosaic_0001>
module attributes {stable_mosaic.version = 11 : i64} {
  func.func @_write_kernel(%arg0: i32, %arg1: i32, %arg2: memref<8x2x6xf32, #tpu.memory_space<vmem>>, %arg3: memref<2x16xf32, #tpu.memory_space<vmem>>, %arg4: memref<8x2x16xf32, #tpu.memory_space<vmem>>) attributes {dimension_semantics = [#tpu.dimension_semantics<parallel>, #tpu.dimension_semantics<parallel>], iteration_bounds = array<i64: 1, 1>, scalar_prefetch = 0 : i64, scratch_operands = 0 : i64, tpu.core_type = #tpu.core_type<tc>, window_params = [{transform_indices = @transform_0, window_bounds = array<i64: 8, 2, 6>}, {transform_indices = @transform_1, window_bounds = array<i64: 2, 16>}, {transform_indices = @transform_2, window_bounds = array<i64: 8, 2, 16>}]} {
    %c0 = arith.constant 0 : index
    %c0_0 = arith.constant 0 : index
    %c0_1 = arith.constant 0 : index
    %0 = vector.load %arg2[%c0, %c0_0, %c0_1] : memref<8x2x6xf32, #tpu.memory_space<vmem>>, vector<8x2x6xf32>
    %c0_2 = arith.constant 0 : index
    %c0_3 = arith.constant 0 : index
    %1 = vector.load %arg3[%c0_2, %c0_3] : memref<2x16xf32, #tpu.memory_space<vmem>>, vector<2x16xf32>
    %2 = tpu.iota {dimensions = array<i32: 2>} : vector<1x1x16xi32>
    %c1_i32 = arith.constant 1 : i32
    %3 = vector.broadcast %c1_i32 : i32 to vector<1x1x16xi32>
    %4 = arith.andi %2, %3 : vector<1x1x16xi32>
    %c0_i32 = arith.constant 0 : i32
    %5 = vector.broadcast %c0_i32 : i32 to vector<1x1x16xi32>
    %6 = arith.cmpi eq, %4, %5 : vector<1x1x16xi32>
    %7 = vector.shape_cast %6 : vector<1x1x16xi1> to vector<1x16xi1>
    %8 = vector.extract_strided_slice %1 {offsets = [0, 1], sizes = [2, 15], strides = [1, 1]} : vector<2x16xf32> to vector<2x15xf32>
    %9 = vector.extract_strided_slice %1 {offsets = [0, 0], sizes = [2, 1], strides = [1, 1]} : vector<2x16xf32> to vector<2x1xf32>
    %10 = tpu.concatenate %8, %9 in 1 : vector<2x15xf32>, vector<2x1xf32> -> vector<2x16xf32>
    %11 = vector.extract_strided_slice %1 {offsets = [0, 15], sizes = [2, 1], strides = [1, 1]} : vector<2x16xf32> to vector<2x1xf32>
    %12 = vector.extract_strided_slice %1 {offsets = [0, 0], sizes = [2, 15], strides = [1, 1]} : vector<2x16xf32> to vector<2x15xf32>
    %13 = tpu.concatenate %11, %12 in 1 : vector<2x1xf32>, vector<2x15xf32> -> vector<2x16xf32>
    %14 = vector.shape_cast %7 : vector<1x16xi1> to vector<1x16xi1>
    %15 = vector.broadcast %14 : vector<1x16xi1> to vector<2x16xi1>
    %16 = arith.select %15, %10, %13 : vector<2x16xi1>, vector<2x16xf32>
    %17 = vector.extract_strided_slice %0 {offsets = [0, 0, 0], sizes = [8, 2, 1], strides = [1, 1, 1]} : vector<8x2x6xf32> to vector<8x2x1xf32>
    %18 = vector.extract_strided_slice %0 {offsets = [0, 0, 1], sizes = [8, 2, 1], strides = [1, 1, 1]} : vector<8x2x6xf32> to vector<8x2x1xf32>
    %19 = vector.shape_cast %6 : vector<1x1x16xi1> to vector<1x1x16xi1>
    %20 = vector.broadcast %19 : vector<1x1x16xi1> to vector<8x2x16xi1>
    %21 = vector.shape_cast %17 : vector<8x2x1xf32> to vector<8x2x1xf32>
    %22 = vector.broadcast %21 : vector<8x2x1xf32> to vector<8x2x16xf32>
    %23 = vector.shape_cast %18 : vector<8x2x1xf32> to vector<8x2x1xf32>
    %24 = vector.broadcast %23 : vector<8x2x1xf32> to vector<8x2x16xf32>
    %25 = arith.select %20, %22, %24 : vector<8x2x16xi1>, vector<8x2x16xf32>
    %26 = vector.extract_strided_slice %0 {offsets = [0, 0, 2], sizes = [8, 2, 1], strides = [1, 1, 1]} : vector<8x2x6xf32> to vector<8x2x1xf32>
    %27 = vector.extract_strided_slice %0 {offsets = [0, 0, 3], sizes = [8, 2, 1], strides = [1, 1, 1]} : vector<8x2x6xf32> to vector<8x2x1xf32>
    %28 = vector.shape_cast %6 : vector<1x1x16xi1> to vector<1x1x16xi1>
    %29 = vector.broadcast %28 : vector<1x1x16xi1> to vector<8x2x16xi1>
    %30 = vector.shape_cast %26 : vector<8x2x1xf32> to vector<8x2x1xf32>
    %31 = vector.broadcast %30 : vector<8x2x1xf32> to vector<8x2x16xf32>
    %32 = vector.shape_cast %27 : vector<8x2x1xf32> to vector<8x2x1xf32>
    %33 = vector.broadcast %32 : vector<8x2x1xf32> to vector<8x2x16xf32>
    %34 = arith.select %29, %31, %33 : vector<8x2x16xi1>, vector<8x2x16xf32>
    %35 = vector.extract_strided_slice %0 {offsets = [0, 0, 4], sizes = [8, 2, 1], strides = [1, 1, 1]} : vector<8x2x6xf32> to vector<8x2x1xf32>
    %36 = vector.extract_strided_slice %0 {offsets = [0, 0, 5], sizes = [8, 2, 1], strides = [1, 1, 1]} : vector<8x2x6xf32> to vector<8x2x1xf32>
    %37 = vector.shape_cast %6 : vector<1x1x16xi1> to vector<1x1x16xi1>
    %38 = vector.broadcast %37 : vector<1x1x16xi1> to vector<8x2x16xi1>
    %39 = vector.shape_cast %35 : vector<8x2x1xf32> to vector<8x2x1xf32>
    %40 = vector.broadcast %39 : vector<8x2x1xf32> to vector<8x2x16xf32>
    %41 = vector.shape_cast %36 : vector<8x2x1xf32> to vector<8x2x1xf32>
    %42 = vector.broadcast %41 : vector<8x2x1xf32> to vector<8x2x16xf32>
    %43 = arith.select %38, %40, %42 : vector<8x2x16xi1>, vector<8x2x16xf32>
    %44 = vector.shape_cast %1 : vector<2x16xf32> to vector<1x2x16xf32>
    %45 = vector.broadcast %44 : vector<1x2x16xf32> to vector<8x2x16xf32>
    %46 = arith.mulf %25, %45 : vector<8x2x16xf32>
    %47 = vector.shape_cast %16 : vector<2x16xf32> to vector<1x2x16xf32>
    %48 = vector.broadcast %47 : vector<1x2x16xf32> to vector<8x2x16xf32>
    %49 = arith.mulf %34, %48 : vector<8x2x16xf32>
    %50 = arith.addf %46, %49 : vector<8x2x16xf32>
    %51 = arith.addf %50, %43 : vector<8x2x16xf32>
    %c0_4 = arith.constant 0 : index
    %c0_5 = arith.constant 0 : index
    %c0_6 = arith.constant 0 : index
    %52 = vector.load %arg4[%c0_4, %c0_5, %c0_6] : memref<8x2x16xf32, #tpu.memory_space<vmem>>, vector<8x2x16xf32>
    tpu.vector_store %arg4[%c0_4, %c0_5, %c0_6], %51 {strides = array<i32>} : memref<8x2x16xf32, #tpu.memory_space<vmem>>, vector<8x2x16xf32>,
    return
  }
  func.func @transform_0(%arg0: i32, %arg1: i32) -> (i32, i32, i32) {
    %c0_i32 = arith.constant 0 : i32
    %c0_i32_0 = arith.constant 0 : i32
    return %arg1, %arg0, %c0_i32 : i32, i32, i32
  }
  func.func @transform_1(%arg0: i32, %arg1: i32) -> (i32, i32) {
    %c0_i32 = arith.constant 0 : i32
    %c0_i32_0 = arith.constant 0 : i32
    return %arg0, %c0_i32 : i32, i32
  }
  func.func @transform_2(%arg0: i32, %arg1: i32) -> (i32, i32, i32) {
    %c0_i32 = arith.constant 0 : i32
    %c0_i32_0 = arith.constant 0 : i32
    return %arg1, %arg0, %c0_i32 : i32, i32, i32
  }
}

</mosaic_0001>

<bundles_post_ra>
// kernel: tpu_custom_call.1
= control target key start
LH: loop header
LB: loop body
LE: loop exit
PB: predicated region body
PF: predicated region fallthrough
CT: control target
= control target key end

     0   :  { %v385_v1 = vmov 0   ;;  %s386_s11 = smov 113   ;;  %s387_s14 = smov 127   ;;  %s595_s0 = inlined_call_operand.vmem [shape: f32[8,2,6], index: 0, kind: input, shape index: {}]   ;;  %s596_s1 = inlined_call_operand.vmem [shape: f32[2,16], index: 1, kind: input, shape index: {}]   ;;  %s597_s2 = inlined_call_operand.hbm [shape: f32[8,2,16], index: 2, kind: output, shape index: {}]  }
   0x1   :  { %v416_v0 = vld [vmem:[%s596_s1] sm:$0x3]  ;;  %341 = vset.pattern.permute.xlu2 %v385_v1  ;;  %343 = vset.pattern.permute.xlu1 %v385_v1 }
   0x2   :  { %34 = vrot.lane.b32.xlu1 %v416_v0, %s386_s11  ;;  %v422_v2 = vld [vmem:[%s595_s0] sm:$0x3]  ;;  %26 = vrot.lane.b32.xlu0 %v416_v0, %s387_s14 }
   0x3   :  { %47 = vperm.xlu2 %341, %v422_v2   ;;  %342 = vset.pattern.permute.xlu0 %v385_v1 }
   0x4   :  { %7 = vsyncpa [#allocation3], 0  ;;  %v429_v3 = vld [vmem:[%s595_s0 + $0x2] sm:$0x3]  ;;  %s388_s16 = smov 1   ;;  %s389_s17 = smov 15   ;;  %v21_v18 = vlaneseq }
   0x5   :  { %v437_v4 = vld [vmem:[%s595_s0 + $0x6] sm:$0x3]  ;;  %v14_v5 = vld [vmem:[%s595_s0 + $0x4] sm:$0x3]  ;;  %v445_v6 = vld [vmem:[%s595_s0 + $0x8] sm:$0x3] }
   0x6   :  { %v452_v7 = vld [vmem:[%s595_s0 + $0xa] sm:$0x3]  ;;  %v19_v8 = vld [vmem:[%s595_s0 + $0xe] sm:$0x3]  ;;  %v460_v9 = vld [vmem:[%s595_s0 + $0xc] sm:$0x3] }
   0x7   :  { %v390_v10 = vmov 1   ;;  %v391_v11 = vmov 2   ;;  %v392_v12 = vmov 3   ;;  %v393_v13 = vmov 4   ;;  %s395_s0 = smov [#allocation2]   ;;  %s316_s5 = sshll.u32 %s597_s2, 4  ;;  %s317_s5 = int_to_ptr.hbm [resolvable:$true] %s316_s5 }
   0x8   :  { %v394_v16 = vmov 5   ;;  %v22_v20 = vand.u32 127, %v21_v18  ;;  %vm40_vm0 = vcmask 7168   ;;  %vm32_vm1 = vcmask 121856   ;;  %s314_s30 = sshll.u32 %s395_s0, 4  ;;  %s396_s6 = smov 32   ;;  %s315_s30 = int_to_ptr.vmem [resolvable:$true] %s314_s30 }
   0x9   :  { %vm301_vm3 = vcmask 123904   ;;  %s397_s7 = smov 2  }
   0xa   :  { %37 = vrot.lane.b32.xlu1 %v416_v0, %s388_s16  ;;  %29 = vrot.lane.b32.xlu0 %v416_v0, %s389_s17  ;;  %v23_v23 = vand.u32 1, %v22_v20 }
   0xb   :  { %52 = vperm.xlu2 %341, %v429_v3  }
   0xc   :  { %vm494_vm2 = vcmp.eq.s32.totalorder %v23_v23, 0 }
  0x12   :  { %62 = vperm.xlu1 %343, %v437_v4   ;;  %57 = vperm.xlu0 %342, %v14_v5  }
  0x13   :  { %67 = vperm.xlu2 %341, %v445_v6  }
  0x1a   :  { %72 = vperm.xlu1 %343, %v452_v7   ;;  %82 = vperm.xlu0 %342, %v19_v8  }
  0x1b   :  { %77 = vperm.xlu2 %341, %v460_v9  }
  0x22   :  { %344 = vset.pattern.permute.xlu1 %v390_v10  ;;  %346 = vset.pattern.permute.xlu0 %v390_v10 }
  0x23   :  { %86 = vperm.xlu1 %344, %v422_v2   ;;  %94 = vperm.xlu0 %346, %v14_v5  }
  0x24   :  { %345 = vset.pattern.permute.xlu2 %v390_v10 }
  0x25   :  { %90 = vperm.xlu2 %345, %v429_v3  }
  0x2b   :  { %98 = vperm.xlu1 %344, %v437_v4   ;;  %114 = vperm.xlu0 %346, %v19_v8  }
  0x2d   :  { %102 = vperm.xlu2 %345, %v445_v6  }
  0x33   :  { %106 = vperm.xlu1 %344, %v452_v7   ;;  %349 = vset.pattern.permute.xlu0 %v391_v11 }
  0x34   :  { %134 = vperm.xlu0 %349, %v14_v5  }
  0x35   :  { %110 = vperm.xlu2 %345, %v460_v9  }
  0x3b   :  { %347 = vset.pattern.permute.xlu1 %v391_v11 }
  0x3c   :  { %126 = vperm.xlu1 %347, %v422_v2   ;;  %154 = vperm.xlu0 %349, %v19_v8  }
  0x3d   :  { %348 = vset.pattern.permute.xlu2 %v391_v11 }
  0x3e   :  { %130 = vperm.xlu2 %348, %v429_v3  }
  0x44   :  { %138 = vperm.xlu1 %347, %v437_v4   ;;  %352 = vset.pattern.permute.xlu0 %v392_v12 }
  0x45   :  { %166 = vperm.xlu0 %352, %v14_v5  }
  0x46   :  { %142 = vperm.xlu2 %348, %v445_v6  }
  0x4c   :  { %146 = vperm.xlu1 %347, %v452_v7  }
  0x4d   :  { %186 = vperm.xlu0 %352, %v19_v8  }
  0x4e   :  { %150 = vperm.xlu2 %348, %v460_v9  }
  0x54   :  { %350 = vset.pattern.permute.xlu1 %v392_v12 }
  0x55   :  { %158 = vperm.xlu1 %350, %v422_v2   ;;  %355 = vset.pattern.permute.xlu0 %v393_v13 }
  0x56   :  { %351 = vset.pattern.permute.xlu2 %v392_v12  ;;  %206 = vperm.xlu0 %355, %v14_v5  }
  0x57   :  { %162 = vperm.xlu2 %351, %v429_v3  }
  0x5d   :  { %170 = vperm.xlu1 %350, %v437_v4   ;;  %v479_v14 = vpop.permute.xlu2 %47 }
  0x5e   :  { %226 = vperm.xlu0 %355, %v19_v8  }
  0x5f   :  { %174 = vperm.xlu2 %351, %v445_v6  }
  0x65   :  { %178 = vperm.xlu1 %350, %v452_v7   ;;  %v483_v15 = vpop.permute.xlu2 %52 }
  0x66   :  { %358 = vset.pattern.permute.xlu0 %v394_v16 }
  0x67   :  { %182 = vperm.xlu2 %351, %v460_v9   ;;  %238 = vperm.xlu0 %358, %v14_v5  }
  0x6d   :  { %353 = vset.pattern.permute.xlu1 %v393_v13  ;;  %v486_v17 = vpop.permute.xlu2 %67 }
  0x6e   :  { %198 = vperm.xlu1 %353, %v422_v2  }
  0x6f   :  { %354 = vset.pattern.permute.xlu2 %v393_v13  ;;  %258 = vperm.xlu0 %358, %v19_v8  }
  0x70   :  { %202 = vperm.xlu2 %354, %v429_v3  }
  0x74   :  { %v35_v19 = vpop.permute.xlu1 %34  ;;  %v27_v21 = vpop.permute.xlu0 %26 }
  0x75   :  { %v490_v22 = vpop.permute.xlu2 %77 }
  0x76   :  { %210 = vperm.xlu1 %353, %v437_v4  }
  0x78   :  { %214 = vperm.xlu2 %354, %v445_v6  }
  0x7c   :  { %v38_v24 = vpop.permute.xlu1 %37  ;;  %v30_v27 = vpop.permute.xlu0 %29 }
  0x7d   :  { %v41_v26 = vsel %vm40_vm0, %v35_v19, %v38_v24  ;;  %v33_v28 = vsel %vm32_vm1, %v27_v21, %v30_v27 }
  0x7e   :  { %218 = vperm.xlu1 %353, %v452_v7   ;;  %v501_v29 = vsel %vm494_vm2, %v33_v28, %v41_v26 }
  0x7f   :  { %v91_v30 = vpop.permute.xlu2 %90 }
  0x80   :  { %v118_v31 = vsel %vm494_vm2, %v483_v15, %v91_v30  ;;  %222 = vperm.xlu2 %354, %v460_v9  }
  0x81   :  { %v270_v56 = vmul.f32 %v118_v31, %v416_v0 }
  0x84   :  { %v507_v32 = vpop.permute.xlu1 %62  ;;  %v58_v33 = vpop.permute.xlu0 %57 }
  0x86   :  { %356 = vset.pattern.permute.xlu1 %v394_v16 }
  0x87   :  { %v103_v34 = vpop.permute.xlu2 %102  ;;  %230 = vperm.xlu1 %356, %v422_v2  }
  0x88   :  { %v121_v35 = vsel %vm494_vm2, %v486_v17, %v103_v34  ;;  %357 = vset.pattern.permute.xlu2 %v394_v16 }
  0x89   :  { %234 = vperm.xlu2 %357, %v429_v3  }
  0x8c   :  { %v514_v36 = vpop.permute.xlu1 %72  ;;  %v83_v37 = vpop.permute.xlu0 %82 }
  0x8f   :  { %v111_v38 = vpop.permute.xlu2 %110  ;;  %242 = vperm.xlu1 %356, %v437_v4   ;;  %v273_v4 = vmul.f32 %v121_v35, %v416_v0 }
  0x90   :  { %v123_v39 = vsel %vm494_vm2, %v490_v22, %v111_v38 }
  0x91   :  { %246 = vperm.xlu2 %357, %v445_v6   ;;  %v275_v16 = vmul.f32 %v123_v39, %v416_v0 }
  0x95   :  { %v87_v40 = vpop.permute.xlu1 %86  ;;  %v95_v42 = vpop.permute.xlu0 %94 }
  0x96   :  { %v117_v41 = vsel %vm494_vm2, %v479_v14, %v87_v40  ;;  %v119_v60 = vsel %vm494_vm2, %v58_v33, %v95_v42 }
  0x97   :  { %250 = vperm.xlu1 %356, %v452_v7   ;;  %v271_v1 = vmul.f32 %v119_v60, %v416_v0  ;;  %v269_v22 = vmul.f32 %v117_v41, %v416_v0 }
  0x98   :  { %v131_v43 = vpop.permute.xlu2 %130 }
  0x99   :  { %254 = vperm.xlu2 %357, %v460_v9  }
  0x9d   :  { %v99_v44 = vpop.permute.xlu1 %98  ;;  %v115_v46 = vpop.permute.xlu0 %114 }
  0x9e   :  { %v120_v45 = vsel %vm494_vm2, %v507_v32, %v99_v44  ;;  %v124_v9 = vsel %vm494_vm2, %v83_v37, %v115_v46 }
  0x9f   :  { %v276_v13 = vmul.f32 %v124_v9, %v416_v0  ;;  %v272_v31 = vmul.f32 %v120_v45, %v416_v0 }
  0xa0   :  { %v143_v47 = vpop.permute.xlu2 %142 }
  0xa5   :  { %v107_v48 = vpop.permute.xlu1 %106 }
  0xa6   :  { %v122_v49 = vsel %vm494_vm2, %v514_v36, %v107_v48  ;;  %v135_v50 = vpop.permute.xlu0 %134 }
  0xa7   :  { %v274_v38 = vmul.f32 %v122_v49, %v416_v0 }
  0xa8   :  { %v151_v51 = vpop.permute.xlu2 %150 }
  0xae   :  { %v127_v52 = vpop.permute.xlu1 %126  ;;  %v155_v53 = vpop.permute.xlu0 %154 }
  0xb1   :  { %v163_v54 = vpop.permute.xlu2 %162 }
  0xb2   :  { %v190_v55 = vsel %vm494_vm2, %v131_v43, %v163_v54 }
  0xb3   :  { %v278_v57 = vmul.f32 %v190_v55, %v501_v29 }
  0xb5   :  { %v286_v58 = vadd.f32 %v278_v57, %v270_v56 }
  0xb6   :  { %v139_v59 = vpop.permute.xlu1 %138 }
  0xb7   :  { %v167_v61 = vpop.permute.xlu0 %166 }
  0xb8   :  { %v191_v62 = vsel %vm494_vm2, %v135_v50, %v167_v61 }
  0xb9   :  { %v175_v63 = vpop.permute.xlu2 %174  ;;  %v279_v2 = vmul.f32 %v191_v62, %v501_v29 }
  0xba   :  { %v193_v3 = vsel %vm494_vm2, %v143_v47, %v175_v63 }
  0xbb   :  { %v281_v5 = vmul.f32 %v193_v3, %v501_v29  ;;  %v287_v6 = vadd.f32 %v279_v2, %v271_v1 }
  0xbd   :  { %v289_v7 = vadd.f32 %v281_v5, %v273_v4 }
  0xbe   :  { %v147_v8 = vpop.permute.xlu1 %146 }
  0xbf   :  { %v187_v10 = vpop.permute.xlu0 %186 }
  0xc0   :  { %v196_v11 = vsel %vm494_vm2, %v155_v53, %v187_v10 }
  0xc1   :  { %v183_v12 = vpop.permute.xlu2 %182  ;;  %v284_v14 = vmul.f32 %v196_v11, %v501_v29 }
  0xc2   :  { %v195_v15 = vsel %vm494_vm2, %v151_v51, %v183_v12 }
  0xc3   :  { %v283_v17 = vmul.f32 %v195_v15, %v501_v29  ;;  %v292_v18 = vadd.f32 %v284_v14, %v276_v13 }
  0xc5   :  { %v291_v19 = vadd.f32 %v283_v17, %v275_v16 }
  0xc7   :  { %v159_v20 = vpop.permute.xlu1 %158 }
  0xc8   :  { %v189_v21 = vsel %vm494_vm2, %v127_v52, %v159_v20  ;;  %v207_v24 = vpop.permute.xlu0 %206 }
  0xc9   :  { %v277_v23 = vmul.f32 %v189_v21, %v501_v29 }
  0xca   :  { %v203_v26 = vpop.permute.xlu2 %202 }
  0xcb   :  { %v285_v27 = vadd.f32 %v277_v23, %v269_v22 }
  0xcf   :  { %v171_v28 = vpop.permute.xlu1 %170 }
  0xd0   :  { %v192_v30 = vsel %vm494_vm2, %v139_v59, %v171_v28  ;;  %v227_v33 = vpop.permute.xlu0 %226 }
  0xd1   :  { %v280_v32 = vmul.f32 %v192_v30, %v501_v29 }
  0xd2   :  { %v215_v34 = vpop.permute.xlu2 %214 }
  0xd3   :  { %v288_v35 = vadd.f32 %v280_v32, %v272_v31 }
  0xd7   :  { %v179_v36 = vpop.permute.xlu1 %178 }
  0xd8   :  { %v194_v37 = vsel %vm494_vm2, %v147_v8, %v179_v36 }
  0xd9   :  { %v282_v39 = vmul.f32 %v194_v37, %v501_v29  ;;  %v239_v40 = vpop.permute.xlu0 %238 }
  0xda   :  { %v223_v41 = vpop.permute.xlu2 %222  ;;  %v263_v42 = vsel %vm494_vm2, %v207_v24, %v239_v40 }
  0xdb   :  { %v290_v43 = vadd.f32 %v282_v39, %v274_v38  ;;  %v295_v44 = vadd.f32 %v287_v6, %v263_v42 }
  0xdd   :  { %304 = vst.msk [vmem:[#allocation2 + $0x4] sm:$0x3] %vm301_vm3, %v295_v44 }
  0xe0   :  { %v199_v45 = vpop.permute.xlu1 %198 }
  0xe1   :  { %v259_v46 = vpop.permute.xlu0 %258 }
  0xe2   :  { %v268_v47 = vsel %vm494_vm2, %v227_v33, %v259_v46 }
  0xe3   :  { %v235_v48 = vpop.permute.xlu2 %234  ;;  %v300_v50 = vadd.f32 %v292_v18, %v268_v47 }
  0xe4   :  { %v262_v0 = vsel %vm494_vm2, %v203_v26, %v235_v48 }
  0xe5   :  { %v294_v29 = vadd.f32 %v286_v58, %v262_v0  ;;  %309 = vst.msk [vmem:[#allocation2 + $0xe] sm:$0x3] %vm301_vm3, %v300_v50 }
  0xe7   :  { %303 = vst.msk [vmem:[#allocation2 + $0x2] sm:$0x3] %vm301_vm3, %v294_v29 }
  0xe8   :  { %v211_v49 = vpop.permute.xlu1 %210 }
  0xeb   :  { %v247_v51 = vpop.permute.xlu2 %246 }
  0xec   :  { %v265_v52 = vsel %vm494_vm2, %v215_v34, %v247_v51 }
  0xed   :  { %v297_v53 = vadd.f32 %v289_v7, %v265_v52 }
  0xef   :  { %306 = vst.msk [vmem:[#allocation2 + $0x8] sm:$0x3] %vm301_vm3, %v297_v53 }
  0xf0   :  { %v219_v54 = vpop.permute.xlu1 %218 }
  0xf3   :  { %v255_v55 = vpop.permute.xlu2 %254 }
  0xf4   :  { %v267_v56 = vsel %vm494_vm2, %v223_v41, %v255_v55 }
  0xf5   :  { %v299_v57 = vadd.f32 %v291_v19, %v267_v56 }
  0xf7   :  { %308 = vst.msk [vmem:[#allocation2 + $0xc] sm:$0x3] %vm301_vm3, %v299_v57 }
  0xf9   :  { %v231_v58 = vpop.permute.xlu1 %230 }
  0xfa   :  { %v261_v59 = vsel %vm494_vm2, %v199_v45, %v231_v58 }
  0xfb   :  { %v293_v60 = vadd.f32 %v285_v27, %v261_v59 }
  0xfd   :  { %302 = vst.msk [vmem:[#allocation2] sm:$0x3] %vm301_vm3, %v293_v60 }
 0x101   :  { %v243_v61 = vpop.permute.xlu1 %242 }
 0x102   :  { %v264_v62 = vsel %vm494_vm2, %v211_v49, %v243_v61 }
 0x103   :  { %v296_v63 = vadd.f32 %v288_v35, %v264_v62 }
 0x105   :  { %305 = vst.msk [vmem:[#allocation2 + $0x6] sm:$0x3] %vm301_vm3, %v296_v63 }
 0x109   :  { %v251_v1 = vpop.permute.xlu1 %250 }
 0x10a   :  { %v266_v2 = vsel %vm494_vm2, %v219_v54, %v251_v1 }
 0x10b   :  { %v298_v3 = vadd.f32 %v290_v43, %v266_v2 }
 0x10d   :  { %307 = vst.msk [vmem:[#allocation2 + $0xa] sm:$0x3] %vm301_vm3, %v298_v3 }
 0x10e   :  { %322 = dma.vmem_to_hbm [thread:$0]  %s315_s30, 256, %s317_s5, [#allocation3], %s396_s6, %s396_s6, %s397_s7  }
 0x10f   :  { %383 = dma.done.wait [#allocation3], 256  }
 0x110   :  { %384 = vsyncadd [#allocation3], 4294967040 }
 0x111   :  { %327 = vsyncpa [#allocation3], 1 }

</bundles_post_ra>
